<compile_context>
chip_gen: v6e
topology: v6e:2x2x1
jax: 0.10.0
libtpu: 0.0.40
codegen_flags: <defaults>
</compile_context>

<pallas_src>
import jax
import jax.numpy as jnp
from jax.experimental import pallas as pl
from jax.experimental.pallas import tpu as pltpu


def _round_up(x, m):
    return ((x + m - 1) // m) * m


def lstm_classifier_kernel(x_ref, wih_ref, whh_ref, b_ref, wfc_ref, bfc_ref,
                           out_ref, h_sc, c_sc, g_sc):
    """Grid = (batch_block ["parallel"], time_chunk ["arbitrary"]).

    x_ref   : (T_chunk*B_blk, E)   bf16, time-major, rows grouped per time step
    wih_ref : (E, G_pad)           bf16, packed gate order [i|f|o|g], G = 4*H
    whh_ref : (H, G_pad)           bf16
    b_ref   : (1, G_pad)           f32, b_ih + b_hh
    wfc_ref : (H, O_pad)           bf16
    bfc_ref : (1, O_pad)           f32
    out_ref : (B_blk, O_pad)       f32, resident across the chunk axis
    h_sc/c_sc : (B_blk, H)         f32 recurrent state, persists across chunks
    g_sc    : (T_chunk*B_blk, G_pad) f32 precomputed input projection
    """
    chunk = pl.program_id(1)
    n_chunks = pl.num_programs(1)

    B_blk, H = h_sc.shape
    G_pad = g_sc.shape[1]
    T_chunk = g_sc.shape[0] // B_blk
    H3 = 3 * H

    @pl.when(chunk == 0)
    def _():
        h_sc[...] = jnp.zeros_like(h_sc)
        c_sc[...] = jnp.zeros_like(c_sc)

    # Phase 1: hoisted input projection for the whole chunk -- one bf16 MXU
    # matmul with f32 accumulation, off the serial critical path.
    g_sc[...] = (jnp.dot(x_ref[...], wih_ref[...],
                         preferred_element_type=jnp.float32) + b_ref[...])

    # Packed-gate activation split mask, hoisted out of the time loop:
    # lanes [0, 3H) -> sigmoid (i|f|o), lanes [3H, 4H) -> tanh (g).
    lane = jax.lax.broadcasted_iota(jnp.int32, (B_blk, G_pad), 1)
    sig_mask = lane < H3

    whh = whh_ref[...]  # bf16, small enough to stay resident in vregs
    # TODO(synk): if profiling shows W_hh re-staged into the MXU every step,
    # switch to pltpu.matmul_push_rhs (once per chunk) + matmul_acc_lhs/pop.

    def step(t, carry):
        h, c = carry
        row0 = t * B_blk
        if not isinstance(row0, int):
            row0 = pl.multiple_of(row0, 8)           # B_blk is a multiple of 8
        g_t = g_sc[pl.ds(row0, B_blk), :]            # (B_blk, G_pad) f32
        gates = g_t + jnp.dot(h.astype(jnp.bfloat16), whh,
                              preferred_element_type=jnp.float32)
        act = jnp.where(sig_mask, jax.nn.sigmoid(gates), jnp.tanh(gates))
        i_g = act[:, 0 * H:1 * H]
        f_g = act[:, 1 * H:2 * H]
        o_g = act[:, 2 * H:3 * H]
        g_g = act[:, 3 * H:4 * H]
        c = f_g * c + i_g * g_g
        h = o_g * jnp.tanh(c)
        return h, c

    h = h_sc[...]
    c = c_sc[...]
    if T_chunk <= 16:
        # Short chunk: fully unrolled, all slices static and sublane-aligned.
        for t in range(T_chunk):
            h, c = step(t, (h, c))
    else:
        # Long chunk: rolled loop with manual 8-step unroll bounds vreg pressure
        # while keeping LLO scheduling visibility.
        UNROLL = 8
        n_blocks = T_chunk // UNROLL

        def block_body(blk, carry):
            t0 = blk * UNROLL
            for u in range(UNROLL):
                carry = step(t0 + u, carry)
            return carry

        h, c = jax.lax.fori_loop(0, n_blocks, block_body, (h, c))
        for t in range(n_blocks * UNROLL, T_chunk):   # static remainder
            h, c = step(t, (h, c))

    h_sc[...] = h
    c_sc[...] = c

    @pl.when(chunk == n_chunks - 1)
    def _():
        out_ref[...] = (jnp.dot(h.astype(jnp.bfloat16), wfc_ref[...],
                                preferred_element_type=jnp.float32)
                        + bfc_ref[...]).astype(out_ref.dtype)


def rnn_classifier_forward(text, embedding_matrix, w_ih, w_hh, b_ih, b_hh,
                           w_fc, b_fc, *, t_chunk=None):
    """text: (B, T) int32 token ids. Returns logits (B, O) float32
    (no softmax, matching the module's forward())."""
    B, T = text.shape
    E = embedding_matrix.shape[1]
    H = w_hh.shape[1]
    O = w_fc.shape[0]
    assert T >= 1

    B_pad = _round_up(B, 8)           # sublane multiple
    G = 4 * H
    G_pad = _round_up(G, 128)         # packed gates: one lane tile when 4H <= 128
    O_pad = _round_up(O, 128)         # lane-dense (unmasked) output store

    # Batch blocking: leading "parallel" grid axis lets megacore / v7x's second
    # TensorCore shard the batch when there is more than one sublane group.
    n_bblk = 2 if (B_pad >= 16 and B_pad % 16 == 0) else 1
    B_blk = B_pad // n_bblk

    # Pick t_chunk: divisor of T, capped so g_sc stays small in VMEM (v7x: 64 MiB)
    # and so long sequences get >= 2 chunks for DMA/compute overlap.
    if t_chunk is None:
        g_row_bytes = B_blk * G_pad * 4
        cap = max(1, min(32, (4 << 20) // g_row_bytes))
        t_chunk = 1
        for d in range(1, T + 1):
            if T % d == 0 and d <= cap:
                t_chunk = d
    # TODO(synk): handle a ragged tail chunk; currently t_chunk must divide T.
    assert T % t_chunk == 0
    n_chunks = T // t_chunk

    # --- Glue (wrapper-side XLA): embedding gather directly in time-major
    # layout, pad batch, group by batch block, cast matmul operand to bf16.
    x_tbe = jnp.take(embedding_matrix.astype(jnp.float32), text.T, axis=0)   # (T,B,E)
    x_tbe = jnp.pad(x_tbe, ((0, 0), (0, B_pad - B), (0, 0)))                 # (T,B_pad,E)
    x4 = x_tbe.reshape(T, n_bblk, B_blk, E).transpose(1, 0, 2, 3)            # (nb,T,B_blk,E)
    x3 = x4.reshape(n_bblk, T * B_blk, E).astype(jnp.bfloat16)

    # --- Glue: reorder PyTorch gates [i,f,g,o] -> packed [i|f|o|g]; zero-pad
    # only the total gate width to a lane multiple (pad lanes stay exactly 0).
    def pack_gates(w):  # (4H, X) rows grouped i,f,g,o -> (G_pad, X)
        i, f, g, o = jnp.split(w, 4, axis=0)
        packed = jnp.concatenate([i, f, o, g], axis=0)
        return jnp.pad(packed, ((0, G_pad - G), (0, 0)))

    wih_t = pack_gates(w_ih).T.astype(jnp.bfloat16)                    # (E, G_pad)
    whh_t = pack_gates(w_hh).T.astype(jnp.bfloat16)                    # (H, G_pad)
    bias = pack_gates((b_ih + b_hh).reshape(G, 1))[:, 0]
    bias = bias.reshape(1, G_pad).astype(jnp.float32)                  # (1, G_pad)
    wfc_t = jnp.pad(w_fc.T.astype(jnp.float32),
                    ((0, 0), (0, O_pad - O))).astype(jnp.bfloat16)     # (H, O_pad)
    bfc = jnp.pad(b_fc.astype(jnp.float32),
                  (0, O_pad - O)).reshape(1, O_pad)                    # (1, O_pad)

    # --- VMEM budget derived from actual (tile-padded) buffer sizes, capped to
    # stay safe on v7x's 64 MiB VMEM per TensorCore.
    def tile_bytes(r, c, itemsize):
        return _round_up(max(r, 1), 16) * _round_up(max(c, 1), 128) * itemsize

    x_chunk_b = tile_bytes(t_chunk * B_blk, E, 2)
    weights_b = (tile_bytes(E, G_pad, 2) + tile_bytes(H, G_pad, 2)
                 + tile_bytes(1, G_pad, 4) + tile_bytes(H, O_pad, 2)
                 + tile_bytes(1, O_pad, 4))
    out_b = tile_bytes(B_blk, O_pad, 4)
    scratch_b = tile_bytes(t_chunk * B_blk, G_pad, 4) + 2 * tile_bytes(B_blk, H, 4)
    needed = 2 * x_chunk_b + 2 * weights_b + 2 * out_b + scratch_b
    vmem_limit_bytes = int(min(max(2 * needed + (1 << 20), 8 << 20), 64 << 20))

    out_pad = pl.pallas_call(
        lstm_classifier_kernel,
        out_shape=jax.ShapeDtypeStruct((B_pad, O_pad), jnp.float32),
        grid_spec=pltpu.PrefetchScalarGridSpec(
            num_scalar_prefetch=0,
            grid=(n_bblk, n_chunks),
            in_specs=[
                pl.BlockSpec((None, t_chunk * B_blk, E), lambda b, c: (b, c, 0)),
                pl.BlockSpec((E, G_pad), lambda b, c: (0, 0)),        # W_ih^T
                pl.BlockSpec((H, G_pad), lambda b, c: (0, 0)),        # W_hh^T
                pl.BlockSpec((1, G_pad), lambda b, c: (0, 0)),        # bias
                pl.BlockSpec((H, O_pad), lambda b, c: (0, 0)),        # W_fc^T
                pl.BlockSpec((1, O_pad), lambda b, c: (0, 0)),        # b_fc
            ],
            out_specs=pl.BlockSpec((B_blk, O_pad), lambda b, c: (b, 0)),
            scratch_shapes=[
                pltpu.VMEM((B_blk, H), jnp.float32),                  # h state
                pltpu.VMEM((B_blk, H), jnp.float32),                  # c state
                pltpu.VMEM((t_chunk * B_blk, G_pad), jnp.float32),    # input proj
            ],
        ),
        compiler_params=pltpu.CompilerParams(
            dimension_semantics=("parallel", "arbitrary"),
            vmem_limit_bytes=vmem_limit_bytes,
        ),
    )(x3, wih_t, whh_t, bias, wfc_t, bfc)

    return out_pad[:B, :O]


def reference_forward(text, embedding_matrix, w_ih, w_hh, b_ih, b_hh, w_fc, b_fc):
    """Pure-JAX f32 reference matching PyTorch nn.LSTM(batch_first=True)+nn.Linear."""
    B, T = text.shape
    H = w_hh.shape[1]
    embedded = embedding_matrix[text]                 # (B, T, E)
    h = jnp.zeros((B, H), jnp.float32)
    c = jnp.zeros((B, H), jnp.float32)
    for t in range(T):
        x_t = embedded[:, t, :]
        gates = x_t @ w_ih.T + b_ih + h @ w_hh.T + b_hh
        i_g = jax.nn.sigmoid(gates[:, 0 * H:1 * H])
        f_g = jax.nn.sigmoid(gates[:, 1 * H:2 * H])
        g_g = jnp.tanh(gates[:, 2 * H:3 * H])
        o_g = jax.nn.sigmoid(gates[:, 3 * H:4 * H])
        c = f_g * c + i_g * g_g
        h = o_g * jnp.tanh(c)
    return h @ w_fc.T + b_fc


if __name__ == "__main__":
    vocab_size, embedding_dim, hidden_dim, output_dim = 50, 16, 32, 4
    batch = 2

    key = jax.random.PRNGKey(0)
    (k_emb, k_wih, k_whh, k_bih, k_bhh,
     k_wfc, k_bfc, k_txt1, k_txt2) = jax.random.split(key, 9)

    embedding_matrix = jax.random.normal(k_emb, (vocab_size, embedding_dim),
                                         jnp.float32) * 0.1
    w_ih = jax.random.normal(k_wih, (4 * hidden_dim, embedding_dim), jnp.float32) * 0.1
    w_hh = jax.random.normal(k_whh, (4 * hidden_dim, hidden_dim), jnp.float32) * 0.1
    b_ih = jax.random.normal(k_bih, (4 * hidden_dim,), jnp.float32) * 0.1
    b_hh = jax.random.normal(k_bhh, (4 * hidden_dim,), jnp.float32) * 0.1
    w_fc = jax.random.normal(k_wfc, (output_dim, hidden_dim), jnp.float32) * 0.1
    b_fc = jax.random.normal(k_bfc, (output_dim,), jnp.float32) * 0.1
    params = (embedding_matrix, w_ih, w_hh, b_ih, b_hh, w_fc, b_fc)

    # Test 1: seq=8, explicit t_chunk=4 -> multi-chunk grid, fully unrolled path.
    text = jax.random.randint(k_txt1, (batch, 8), 0, vocab_size, jnp.int32)
    out = jax.block_until_ready(rnn_classifier_forward(text, *params, t_chunk=4))
    ref = reference_forward(text, *params)
    assert out.shape == (batch, output_dim)
    assert jnp.allclose(out, ref, atol=1e-2, rtol=1e-2), (out, ref)

    # Test 2: seq=48, auto chunking (t_chunk=24) -> rolled/unrolled fori path.
    text2 = jax.random.randint(k_txt2, (batch, 48), 0, vocab_size, jnp.int32)
    out2 = jax.block_until_ready(rnn_classifier_forward(text2, *params))
    ref2 = reference_forward(text2, *params)
    assert jnp.allclose(out2, ref2, atol=1e-2, rtol=1e-2), (out2, ref2)

    print("KERNEL_OK")
</pallas_src>

<mosaic_0001>
module attributes {stable_mosaic.version = 11 : i64} {
  func.func @lstm_classifier_kernel(%arg0: i32, %arg1: i32, %arg2: memref<1x32x16xbf16, #tpu.memory_space<vmem>>, %arg3: memref<16x128xbf16, #tpu.memory_space<vmem>>, %arg4: memref<32x128xbf16, #tpu.memory_space<vmem>>, %arg5: memref<1x128xf32, #tpu.memory_space<vmem>>, %arg6: memref<32x128xbf16, #tpu.memory_space<vmem>>, %arg7: memref<1x128xf32, #tpu.memory_space<vmem>>, %arg8: memref<8x128xf32, #tpu.memory_space<vmem>>, %arg9: memref<8x32xf32, #tpu.memory_space<vmem>>, %arg10: memref<8x32xf32, #tpu.memory_space<vmem>>, %arg11: memref<32x128xf32, #tpu.memory_space<vmem>>) attributes {dimension_semantics = [#tpu.dimension_semantics<parallel>, #tpu.dimension_semantics<arbitrary>], iteration_bounds = array<i64: 1, 2>, scalar_prefetch = 0 : i64, scratch_operands = 3 : i64, tpu.core_type = #tpu.core_type<tc>, window_params = [{transform_indices = @transform_0, window_bounds = array<i64: 1, 32, 16>}, {pipeline_mode = #tpu.pipeline_mode<synchronous>, transform_indices = @transform_1, window_bounds = array<i64: 16, 128>}, {pipeline_mode = #tpu.pipeline_mode<synchronous>, transform_indices = @transform_2, window_bounds = array<i64: 32, 128>}, {pipeline_mode = #tpu.pipeline_mode<synchronous>, transform_indices = @transform_3, window_bounds = array<i64: 1, 128>}, {pipeline_mode = #tpu.pipeline_mode<synchronous>, transform_indices = @transform_4, window_bounds = array<i64: 32, 128>}, {pipeline_mode = #tpu.pipeline_mode<synchronous>, transform_indices = @transform_5, window_bounds = array<i64: 1, 128>}, {transform_indices = @transform_6, window_bounds = array<i64: 8, 128>}]} {
    %c0_i32 = arith.constant 0 : i32
    %0 = arith.cmpi eq, %arg1, %c0_i32 : i32
    %1 = arith.extui %0 : i1 to i32
    %c0_i32_0 = arith.constant 0 : i32
    %2 = arith.cmpi ne, %1, %c0_i32_0 : i32
    scf.if %2 {
      %cst_33 = arith.constant 0.000000e+00 : f32
      %102 = vector.broadcast %cst_33 : f32 to vector<8x32xf32>
      %c0_34 = arith.constant 0 : index
      %c0_35 = arith.constant 0 : index
      %103 = vector.load %arg9[%c0_34, %c0_35] : memref<8x32xf32, #tpu.memory_space<vmem>>, vector<8x32xf32>
      tpu.vector_store %arg9[%c0_34, %c0_35], %102 {strides = array<i32>} : memref<8x32xf32, #tpu.memory_space<vmem>>, vector<8x32xf32>,
      %cst_36 = arith.constant 0.000000e+00 : f32
      %104 = vector.broadcast %cst_36 : f32 to vector<8x32xf32>
      %c0_37 = arith.constant 0 : index
      %c0_38 = arith.constant 0 : index
      %105 = vector.load %arg10[%c0_37, %c0_38] : memref<8x32xf32, #tpu.memory_space<vmem>>, vector<8x32xf32>
      tpu.vector_store %arg10[%c0_37, %c0_38], %104 {strides = array<i32>} : memref<8x32xf32, #tpu.memory_space<vmem>>, vector<8x32xf32>,
    } else {
    }
    %c0 = arith.constant 0 : index
    %c0_1 = arith.constant 0 : index
    %c0_2 = arith.constant 0 : index
    %3 = vector.load %arg2[%c0, %c0_1, %c0_2] : memref<1x32x16xbf16, #tpu.memory_space<vmem>>, vector<1x32x16xbf16>
    %4 = vector.shape_cast %3 : vector<1x32x16xbf16> to vector<32x16xbf16>
    %c0_3 = arith.constant 0 : index
    %c0_4 = arith.constant 0 : index
    %5 = vector.load %arg3[%c0_3, %c0_4] : memref<16x128xbf16, #tpu.memory_space<vmem>>, vector<16x128xbf16>
    %cst = arith.constant dense<0.000000e+00> : vector<32x128xf32>
    %6 = tpu.matmul %4, %5, %cst {dimension_numbers = #tpu.dot_dimension_numbers<[1], [0], [0], [1], [0, 0, 1, 1], [], []>} : vector<32x16xbf16>, vector<16x128xbf16>, vector<32x128xf32> -> vector<32x128xf32>
    %c0_5 = arith.constant 0 : index
    %c0_6 = arith.constant 0 : index
    %7 = vector.load %arg5[%c0_5, %c0_6] : memref<1x128xf32, #tpu.memory_space<vmem>>, vector<1x128xf32>
    %8 = vector.broadcast %7 : vector<1x128xf32> to vector<32x128xf32>
    %9 = arith.addf %6, %8 : vector<32x128xf32>
    %c0_7 = arith.constant 0 : index
    %c0_8 = arith.constant 0 : index
    %10 = vector.load %arg11[%c0_7, %c0_8] : memref<32x128xf32, #tpu.memory_space<vmem>>, vector<32x128xf32>
    tpu.vector_store %arg11[%c0_7, %c0_8], %9 {strides = array<i32>} : memref<32x128xf32, #tpu.memory_space<vmem>>, vector<32x128xf32>,
    %11 = tpu.iota {dimensions = array<i32: 1>} : vector<8x128xi32>
    %c96_i32 = arith.constant 96 : i32
    %12 = vector.broadcast %c96_i32 : i32 to vector<8x128xi32>
    %13 = arith.cmpi slt, %11, %12 : vector<8x128xi32>
    %c0_9 = arith.constant 0 : index
    %c0_10 = arith.constant 0 : index
    %14 = vector.load %arg4[%c0_9, %c0_10] : memref<32x128xbf16, #tpu.memory_space<vmem>>, vector<32x128xbf16>
    %c0_11 = arith.constant 0 : index
    %c0_12 = arith.constant 0 : index
    %15 = vector.load %arg9[%c0_11, %c0_12] : memref<8x32xf32, #tpu.memory_space<vmem>>, vector<8x32xf32>
    %c0_13 = arith.constant 0 : index
    %c0_14 = arith.constant 0 : index
    %16 = vector.load %arg10[%c0_13, %c0_14] : memref<8x32xf32, #tpu.memory_space<vmem>>, vector<8x32xf32>
    %c0_15 = arith.constant 0 : index
    %c0_16 = arith.constant 0 : index
    %17 = vector.load %arg11[%c0_15, %c0_16] : memref<32x128xf32, #tpu.memory_space<vmem>>, vector<8x128xf32>
    %18 = arith.truncf %15 : vector<8x32xf32> to vector<8x32xbf16>
    %cst_17 = arith.constant dense<0.000000e+00> : vector<8x128xf32>
    %19 = tpu.matmul %18, %14, %cst_17 {dimension_numbers = #tpu.dot_dimension_numbers<[1], [0], [0], [1], [0, 0, 1, 1], [], []>} : vector<8x32xbf16>, vector<32x128xbf16>, vector<8x128xf32> -> vector<8x128xf32>
    %20 = arith.addf %17, %19 : vector<8x128xf32>
    %21 = arith.negf %20 : vector<8x128xf32>
    %22 = math.exp %21 : vector<8x128xf32>
    %cst_18 = arith.constant 1.000000e+00 : f32
    %23 = vector.broadcast %cst_18 : f32 to vector<8x128xf32>
    %24 = arith.addf %23, %22 : vector<8x128xf32>
    %25 = arith.divf %23, %24 : vector<8x128xf32>
    %26 = math.tanh %20 : vector<8x128xf32>
    %27 = arith.select %13, %25, %26 : vector<8x128xi1>, vector<8x128xf32>
    %28 = vector.extract_strided_slice %27 {offsets = [0, 0], sizes = [8, 32], strides = [1, 1]} : vector<8x128xf32> to vector<8x32xf32>
    %29 = vector.extract_strided_slice %27 {offsets = [0, 32], sizes = [8, 32], strides = [1, 1]} : vector<8x128xf32> to vector<8x32xf32>
    %30 = vector.extract_strided_slice %27 {offsets = [0, 64], sizes = [8, 32], strides = [1, 1]} : vector<8x128xf32> to vector<8x32xf32>
    %31 = vector.extract_strided_slice %27 {offsets = [0, 96], sizes = [8, 32], strides = [1, 1]} : vector<8x128xf32> to vector<8x32xf32>
    %32 = arith.mulf %29, %16 : vector<8x32xf32>
    %33 = arith.mulf %28, %31 : vector<8x32xf32>
    %34 = arith.addf %32, %33 : vector<8x32xf32>
    %35 = math.tanh %34 : vector<8x32xf32>
    %36 = arith.mulf %30, %35 : vector<8x32xf32>
    %c8 = arith.constant 8 : index
    %c0_19 = arith.constant 0 : index
    %37 = vector.load %arg11[%c8, %c0_19] : memref<32x128xf32, #tpu.memory_space<vmem>>, vector<8x128xf32>
    %38 = arith.truncf %36 : vector<8x32xf32> to vector<8x32xbf16>
    %cst_20 = arith.constant dense<0.000000e+00> : vector<8x128xf32>
    %39 = tpu.matmul %38, %14, %cst_20 {dimension_numbers = #tpu.dot_dimension_numbers<[1], [0], [0], [1], [0, 0, 1, 1], [], []>} : vector<8x32xbf16>, vector<32x128xbf16>, vector<8x128xf32> -> vector<8x128xf32>
    %40 = arith.addf %37, %39 : vector<8x128xf32>
    %41 = arith.negf %40 : vector<8x128xf32>
    %42 = math.exp %41 : vector<8x128xf32>
    %cst_21 = arith.constant 1.000000e+00 : f32
    %43 = vector.broadcast %cst_21 : f32 to vector<8x128xf32>
    %44 = arith.addf %43, %42 : vector<8x128xf32>
    %45 = arith.divf %43, %44 : vector<8x128xf32>
    %46 = math.tanh %40 : vector<8x128xf32>
    %47 = arith.select %13, %45, %46 : vector<8x128xi1>, vector<8x128xf32>
    %48 = vector.extract_strided_slice %47 {offsets = [0, 0], sizes = [8, 32], strides = [1, 1]} : vector<8x128xf32> to vector<8x32xf32>
    %49 = vector.extract_strided_slice %47 {offsets = [0, 32], sizes = [8, 32], strides = [1, 1]} : vector<8x128xf32> to vector<8x32xf32>
    %50 = vector.extract_strided_slice %47 {offsets = [0, 64], sizes = [8, 32], strides = [1, 1]} : vector<8x128xf32> to vector<8x32xf32>
    %51 = vector.extract_strided_slice %47 {offsets = [0, 96], sizes = [8, 32], strides = [1, 1]} : vector<8x128xf32> to vector<8x32xf32>
    %52 = arith.mulf %49, %34 : vector<8x32xf32>
    %53 = arith.mulf %48, %51 : vector<8x32xf32>
    %54 = arith.addf %52, %53 : vector<8x32xf32>
    %55 = math.tanh %54 : vector<8x32xf32>
    %56 = arith.mulf %50, %55 : vector<8x32xf32>
    %c16 = arith.constant 16 : index
    %c0_22 = arith.constant 0 : index
    %57 = vector.load %arg11[%c16, %c0_22] : memref<32x128xf32, #tpu.memory_space<vmem>>, vector<8x128xf32>
    %58 = arith.truncf %56 : vector<8x32xf32> to vector<8x32xbf16>
    %cst_23 = arith.constant dense<0.000000e+00> : vector<8x128xf32>
    %59 = tpu.matmul %58, %14, %cst_23 {dimension_numbers = #tpu.dot_dimension_numbers<[1], [0], [0], [1], [0, 0, 1, 1], [], []>} : vector<8x32xbf16>, vector<32x128xbf16>, vector<8x128xf32> -> vector<8x128xf32>
    %60 = arith.addf %57, %59 : vector<8x128xf32>
    %61 = arith.negf %60 : vector<8x128xf32>
    %62 = math.exp %61 : vector<8x128xf32>
    %cst_24 = arith.constant 1.000000e+00 : f32
    %63 = vector.broadcast %cst_24 : f32 to vector<8x128xf32>
    %64 = arith.addf %63, %62 : vector<8x128xf32>
    %65 = arith.divf %63, %64 : vector<8x128xf32>
    %66 = math.tanh %60 : vector<8x128xf32>
    %67 = arith.select %13, %65, %66 : vector<8x128xi1>, vector<8x128xf32>
    %68 = vector.extract_strided_slice %67 {offsets = [0, 0], sizes = [8, 32], strides = [1, 1]} : vector<8x128xf32> to vector<8x32xf32>
    %69 = vector.extract_strided_slice %67 {offsets = [0, 32], sizes = [8, 32], strides = [1, 1]} : vector<8x128xf32> to vector<8x32xf32>
    %70 = vector.extract_strided_slice %67 {offsets = [0, 64], sizes = [8, 32], strides = [1, 1]} : vector<8x128xf32> to vector<8x32xf32>
    %71 = vector.extract_strided_slice %67 {offsets = [0, 96], sizes = [8, 32], strides = [1, 1]} : vector<8x128xf32> to vector<8x32xf32>
    %72 = arith.mulf %69, %54 : vector<8x32xf32>
    %73 = arith.mulf %68, %71 : vector<8x32xf32>
    %74 = arith.addf %72, %73 : vector<8x32xf32>
    %75 = math.tanh %74 : vector<8x32xf32>
    %76 = arith.mulf %70, %75 : vector<8x32xf32>
    %c24 = arith.constant 24 : index
    %c0_25 = arith.constant 0 : index
    %77 = vector.load %arg11[%c24, %c0_25] : memref<32x128xf32, #tpu.memory_space<vmem>>, vector<8x128xf32>
    %78 = arith.truncf %76 : vector<8x32xf32> to vector<8x32xbf16>
    %cst_26 = arith.constant dense<0.000000e+00> : vector<8x128xf32>
    %79 = tpu.matmul %78, %14, %cst_26 {dimension_numbers = #tpu.dot_dimension_numbers<[1], [0], [0], [1], [0, 0, 1, 1], [], []>} : vector<8x32xbf16>, vector<32x128xbf16>, vector<8x128xf32> -> vector<8x128xf32>
    %80 = arith.addf %77, %79 : vector<8x128xf32>
    %81 = arith.negf %80 : vector<8x128xf32>
    %82 = math.exp %81 : vector<8x128xf32>
    %cst_27 = arith.constant 1.000000e+00 : f32
    %83 = vector.broadcast %cst_27 : f32 to vector<8x128xf32>
    %84 = arith.addf %83, %82 : vector<8x128xf32>
    %85 = arith.divf %83, %84 : vector<8x128xf32>
    %86 = math.tanh %80 : vector<8x128xf32>
    %87 = arith.select %13, %85, %86 : vector<8x128xi1>, vector<8x128xf32>
    %88 = vector.extract_strided_slice %87 {offsets = [0, 0], sizes = [8, 32], strides = [1, 1]} : vector<8x128xf32> to vector<8x32xf32>
    %89 = vector.extract_strided_slice %87 {offsets = [0, 32], sizes = [8, 32], strides = [1, 1]} : vector<8x128xf32> to vector<8x32xf32>
    %90 = vector.extract_strided_slice %87 {offsets = [0, 64], sizes = [8, 32], strides = [1, 1]} : vector<8x128xf32> to vector<8x32xf32>
    %91 = vector.extract_strided_slice %87 {offsets = [0, 96], sizes = [8, 32], strides = [1, 1]} : vector<8x128xf32> to vector<8x32xf32>
    %92 = arith.mulf %89, %74 : vector<8x32xf32>
    %93 = arith.mulf %88, %91 : vector<8x32xf32>
    %94 = arith.addf %92, %93 : vector<8x32xf32>
    %95 = math.tanh %94 : vector<8x32xf32>
    %96 = arith.mulf %90, %95 : vector<8x32xf32>
    %c0_28 = arith.constant 0 : index
    %c0_29 = arith.constant 0 : index
    %97 = vector.load %arg9[%c0_28, %c0_29] : memref<8x32xf32, #tpu.memory_space<vmem>>, vector<8x32xf32>
    tpu.vector_store %arg9[%c0_28, %c0_29], %96 {strides = array<i32>} : memref<8x32xf32, #tpu.memory_space<vmem>>, vector<8x32xf32>,
    %c0_30 = arith.constant 0 : index
    %c0_31 = arith.constant 0 : index
    %98 = vector.load %arg10[%c0_30, %c0_31] : memref<8x32xf32, #tpu.memory_space<vmem>>, vector<8x32xf32>
    tpu.vector_store %arg10[%c0_30, %c0_31], %94 {strides = array<i32>} : memref<8x32xf32, #tpu.memory_space<vmem>>, vector<8x32xf32>,
    %c1_i32 = arith.constant 1 : i32
    %99 = arith.cmpi eq, %arg1, %c1_i32 : i32
    %100 = arith.extui %99 : i1 to i32
    %c0_i32_32 = arith.constant 0 : i32
    %101 = arith.cmpi ne, %100, %c0_i32_32 : i32
    scf.if %101 {
      %102 = arith.truncf %96 : vector<8x32xf32> to vector<8x32xbf16>
      %c0_33 = arith.constant 0 : index
      %c0_34 = arith.constant 0 : index
      %103 = vector.load %arg6[%c0_33, %c0_34] : memref<32x128xbf16, #tpu.memory_space<vmem>>, vector<32x128xbf16>
      %cst_35 = arith.constant dense<0.000000e+00> : vector<8x128xf32>
      %104 = tpu.matmul %102, %103, %cst_35 {dimension_numbers = #tpu.dot_dimension_numbers<[1], [0], [0], [1], [0, 0, 1, 1], [], []>} : vector<8x32xbf16>, vector<32x128xbf16>, vector<8x128xf32> -> vector<8x128xf32>
      %c0_36 = arith.constant 0 : index
      %c0_37 = arith.constant 0 : index
      %105 = vector.load %arg7[%c0_36, %c0_37] : memref<1x128xf32, #tpu.memory_space<vmem>>, vector<1x128xf32>
      %106 = vector.broadcast %105 : vector<1x128xf32> to vector<8x128xf32>
      %107 = arith.addf %104, %106 : vector<8x128xf32>
      %c0_38 = arith.constant 0 : index
      %c0_39 = arith.constant 0 : index
      %108 = vector.load %arg8[%c0_38, %c0_39] : memref<8x128xf32, #tpu.memory_space<vmem>>, vector<8x128xf32>
      tpu.vector_store %arg8[%c0_38, %c0_39], %107 {strides = array<i32>} : memref<8x128xf32, #tpu.memory_space<vmem>>, vector<8x128xf32>,
    } else {
    }
    return
  }
  func.func @transform_0(%arg0: i32, %arg1: i32) -> (i32, i32, i32) {
    %c0_i32 = arith.constant 0 : i32
    %c0_i32_0 = arith.constant 0 : i32
    return %arg0, %arg1, %c0_i32 : i32, i32, i32
  }
  func.func @transform_1(%arg0: i32, %arg1: i32) -> (i32, i32) {
    %c0_i32 = arith.constant 0 : i32
    %c0_i32_0 = arith.constant 0 : i32
    %c0_i32_1 = arith.constant 0 : i32
    return %c0_i32, %c0_i32_0 : i32, i32
  }
  func.func @transform_2(%arg0: i32, %arg1: i32) -> (i32, i32) {
    %c0_i32 = arith.constant 0 : i32
    %c0_i32_0 = arith.constant 0 : i32
    %c0_i32_1 = arith.constant 0 : i32
    return %c0_i32, %c0_i32_0 : i32, i32
  }
  func.func @transform_3(%arg0: i32, %arg1: i32) -> (i32, i32) {
    %c0_i32 = arith.constant 0 : i32
    %c0_i32_0 = arith.constant 0 : i32
    %c0_i32_1 = arith.constant 0 : i32
    return %c0_i32, %c0_i32_0 : i32, i32
  }
  func.func @transform_4(%arg0: i32, %arg1: i32) -> (i32, i32) {
    %c0_i32 = arith.constant 0 : i32
    %c0_i32_0 = arith.constant 0 : i32
    %c0_i32_1 = arith.constant 0 : i32
    return %c0_i32, %c0_i32_0 : i32, i32
  }
  func.func @transform_5(%arg0: i32, %arg1: i32) -> (i32, i32) {
    %c0_i32 = arith.constant 0 : i32
    %c0_i32_0 = arith.constant 0 : i32
    %c0_i32_1 = arith.constant 0 : i32
    return %c0_i32, %c0_i32_0 : i32, i32
  }
  func.func @transform_6(%arg0: i32, %arg1: i32) -> (i32, i32) {
    %c0_i32 = arith.constant 0 : i32
    %c0_i32_0 = arith.constant 0 : i32
    return %arg0, %c0_i32 : i32, i32
  }
}

</mosaic_0001>

<bundles_post_ra>
// kernel: tpu_custom_call.1
= control target key start
LH: loop header
LB: loop body
LE: loop exit
PB: predicated region body
PF: predicated region fallthrough
CT: control target
= control target key end

     0   :  { %11 = vsyncpa [#allocation6], 0  ;;  %s1109_s21 = smov 0   ;;  %s1111_s22 = smov 0   ;;  %s1252_s0 = inlined_call_operand.vmem [shape: bf16[1,64,16], index: 0, kind: input, shape index: {}]   ;;  %s1253_s1 = inlined_call_operand.vmem [shape: bf16[16,128], index: 1, kind: input, shape index: {}]   ;;  %s1254_s2 = inlined_call_operand.vmem [shape: bf16[32,128], index: 2, kind: input, shape index: {}]   ;;  %s1255_s3 = inlined_call_operand.vmem [shape: f32[1,128], index: 3, kind: input, shape index: {}]   ;;  %s1256_s4 = inlined_call_operand.vmem [shape: bf16[32,128], index: 4, kind: input, shape index: {}]   ;;  %s1257_s5 = inlined_call_operand.vmem [shape: f32[1,128], index: 5, kind: input, shape index: {}]   ;;  %s1258_s6 = inlined_call_operand.hbm [shape: f32[8,128], index: 6, kind: output, shape index: {}]  }
   0x1   :  { %s1113_s23 = smov 0  }
   0x2 LB: > { %s837_s24 = sadd.s32 4294967295, %s1062_s23   ;;  %s26_s25 = sadd.s32 1, %s1058_s22  ;;  %s1062_s23 = sphi %s1113_s23, %s17_s23   ;;  %s1058_s22 = sphi %s1111_s22, %s1261_s22   ;;  %s1054_s21 = sphi %s1109_s21, %s1260_s21  }
   0x3   : > { %p27_p0 = scmp.ge.s32.totalorder %s26_s25, 2  ;;  %p840_p1 = scmp.ge.s32.totalorder %s1062_s23, 1 }
   0x4   : > { %p232_p2 = scmp.lt.s32.totalorder %s1062_s23, 3 }
   0x5   : > { %s1263_s25 = smov (%p27_p0, %s26_s25), 0 }
   0x6   : > { %p233_p3 = pnand %p840_p1, %p232_p2 }
   0x7   : > { %s841_s26 = sshll.u32 (!%p233_p3), %s1054_s21, 2  ;;  %p843_p5 = scmp.ne.s32.totalorder (!%p233_p3), %s1054_s21, 0 }
   0x8   : > { %236 = sbr.rel (%p233_p3) target bundleno = 3199 (0xc7f), region = 44  ;;  %p264_p4 = scmp.lt.s32.totalorder (!%p233_p3), %s841_s26, 7 }
   0xd   : > { %s1265_s26 = smov (!%p264_p4, %s841_s26), 7  ;;  %275 = sbr.rel (%p843_p5) target bundleno = 20 (0x14), region = 48 }
   0xe   : > { %s842_s27 = sshll.u32 %s1265_s26, 2 }
   0xf   : > { %s269_s30 = scalar_lea.vmem %s1252_s0, %s842_s27 }
  0x12   : > { %vm276_vm0 = vcmask 261120   ;;  %v1064_v0 = vmov 0.0  }
  0x13   : > { %277 = vst.msk [vmem:[#allocation2] sm:$0xff] %vm276_vm0, %v1064_v0  ;;  %278 = vst.msk [vmem:[#allocation3] sm:$0xff] %vm276_vm0, %v1064_v0 }
  0x14 PF: > { %v973_v1 = vld [vmem:[%s1253_s1] sm:$0xff]   ;;  %v1065_v2 = vmov 0.0   ;;  %v1142_v3 = vld [vmem:[%s1254_s2 + $0x8] sm:$0xff]   ;;  %vm308_vm1 = vcmask 130048   ;;  %vm1066_vm2 = vmmov 0   ;;  %vm391_vm3 = vcmask 261120  }
  0x15   : > { %893 = vmatprep.subr.bf16.mxu1 %v1065_v2  ;;  %887 = vmatprep.subr.bf16.mxu0 %v973_v1  ;;  %v975_v4 = vld [vmem:[%s269_s30] sm:$0xff]   ;;  %v976_v5 = vld [vmem:[%s269_s30 + $0x8] sm:$0xff]   ;;  %v368_v24 = vlaneseq  ;;  %s1067_s15 = smov 32   ;;  %s1068_s16 = smov 64  }
  0x16   : > { %894 = vmatpush3.bf16.msra.mxu1 %v1142_v3  ;;  %888 = vmatpush3.bf16.msra.mxu0 %v973_v1  ;;  %v1149_v6 = vld [vmem:[%s1254_s2] sm:$0xff]   ;;  %s1069_s17 = smov 96   ;;  %p860_p6 = scmp.ne.s32.totalorder %s1054_s21, 1 }
  0x17   : > { %889 = vmatprep.mubr.msk.bf16.mxu0 %vm308_vm1, %v975_v4  ;;  %895 = vmatprep.subr.bf16.mxu1 %v1065_v2  ;;  %v844_v9 = vld [vmem:[%s1255_s3] ss:$0 sm:$0xff]  ;;  %v1175_v25 = vand.u32 127, %v368_v24  ;;  %s1071_s20 = smov (!%p860_p6), 64  }
  0x18   : > { %897 = vmatprep.mubr.msk.bf16.mxu1 %vm1066_vm2, %v1065_v2  ;;  %901 = vmatprep.subr.bf16.mxu0 %v1065_v2 }
  0x19   : > { %890 = vmatmul.mubr.msk.bf16.vlgmr.msra.gmra.mxu0 %vm308_vm1, %v976_v5  ;;  %vm370_vm4 = vcmp.lt.s32.totalorder %v1175_v25, 96 }
  0x1a   : > { %v375_v7 = vld [vmem:[#allocation2] sm:$0xff]  ;;  %896 = vmatpush3.bf16.msra.mxu1 %v1149_v6  ;;  %902 = vmatpush3.bf16.msra.mxu0 %v1142_v3  ;;  %v376_v29 = vld [vmem:[#allocation3] sm:$0xff] }
  0x1b   : > { %v378_v8 = vpack.c.bf16 %v375_v7, %v375_v7  ;;  %903 = vmatprep.subr.bf16.mxu0 %v1065_v2  ;;  %905 = vmatprep.mubr.msk.bf16.mxu0 %vm1066_vm2, %v1065_v2 }
  0x1c   : > { %909 = vmatprep.subr.bf16.mxu1 %v1065_v2 }
  0x1d   : > { %898 = vmatmul.mubr.msk.bf16.vlgmr.msra.gmra.mxu1 %vm391_vm3, %v378_v8 }
  0x1e   : > { %904 = vmatpush3.bf16.msra.mxu0 %v1149_v6  ;;  %910 = vmatpush3.bf16.msra.mxu1 %v1142_v3 }
  0x1f   : > { %911 = vmatprep.subr.bf16.mxu1 %v1065_v2  ;;  %913 = vmatprep.mubr.msk.bf16.mxu1 %vm1066_vm2, %v1065_v2 }
  0x20   : > { %917 = vmatprep.subr.bf16.mxu0 %v1065_v2 }
  0x22   : > { %912 = vmatpush3.bf16.msra.mxu1 %v1149_v6 }
  0xd9   : > { %v891_v10 = vpop.f32.mrf.mxu0 }
  0xda   : > { %v1171_v11 = vadd.f32 %v891_v10, %v844_v9 }
  0xdb   : > { %v349_v12 = vpop.f32.mrf.mxu0 }
  0xdc   : > { %v350_v13 = vadd.f32 %v844_v9, %v349_v12 }
  0xdd   : > { %v429_v14 = vpop.f32.mrf.mxu1  ;;  %v892_v15 = vpop.f32.mrf.mxu0 }
  0xde   : > { %v435_v16 = vadd.f32 %v429_v14, %v350_v13  ;;  %v1173_v17 = vadd.f32 %v892_v15, %v844_v9 }
  0xdf   : > { %v899_v18 = vpop.f32.mrf.mxu1  ;;  %v352_v41 = vpop.f32.mrf.mxu0 }
  0xe0   : > { %v853_v19 = vmul.f32 -1.442695, %v435_v16  ;;  %v353_v42 = vadd.f32 %v844_v9, %v352_v41 }
  0xe1   : > { %v432_v20 = vpop.f32.mrf.mxu1 }
  0xe2   : > { %978 = vpow2.f32 %v853_v19 }
  0xe3   : > { %v900_v21 = vpop.f32.mrf.mxu1  ;;  %980 = vtanh.f32 %v435_v16 }
  0xef   : > { %v979_v22 = vpop.eup %978 }
  0xf0   : > { %v439_v23 = vadd.f32 1.0, %v979_v22  ;;  %v981_v26 = vpop.eup %980 }
  0xf2   : > { %982 = vrcp.f32 %v439_v23 }
  0xff   : > { %v983_v27 = vpop.eup %982 }
 0x100   : > { %v443_v28 = vsel %vm370_vm4, %v983_v27, %v981_v26 }
 0x101   : > { %450 = vrot.lane.b32.xlu0 %v443_v28, %s1067_s15 }
 0x105   : > { %445 = vrot.lane.b32.xlu0 %v376_v29, %s1067_s15 }
 0x173   : > { %v451_v30 = vpop.permute.xlu0 %450 }
 0x174   : > { %v453_v31 = vmul.f32 %v451_v30, %v443_v28 }
 0x176   : > { %455 = vrot.lane.b32.xlu1 %v453_v31, %s1067_s15 }
 0x177   : > { %v446_v32 = vpop.permute.xlu0 %445 }
 0x178   : > { %v448_v33 = vmul.f32 %v446_v32, %v443_v28 }
 0x1e8   : > { %v456_v34 = vpop.permute.xlu1 %455 }
 0x1e9   : > { %v458_v35 = vadd.f32 %v456_v34, %v448_v33 }
 0x1eb   : > { %984 = vtanh.f32 %v458_v35 }
 0x1f8   : > { %v985_v36 = vpop.eup %984 }
 0x1f9   : > { %461 = vrot.lane.b32.xlu1 %v985_v36, %s1067_s15 }
 0x26b   : > { %v462_v37 = vpop.permute.xlu1 %461 }
 0x26c   : > { %v464_v38 = vmul.f32 %v462_v37, %v443_v28 }
 0x26e   : > { %v466_v39 = vpack.c.bf16 %v464_v38, %v464_v38 }
 0x270   : > { %468 = vrot.lane.b32.xlu0 %v466_v39, %s1068_s16 }
 0x2e2   : > { %v469_v40 = vpop.permute.xlu0 %468 }
 0x2e3   : > { %906 = vmatmul.mubr.msk.bf16.vlgmr.msra.gmra.mxu0 %vm391_vm3, %v469_v40 }
 0x2e4   : > { %918 = vmatpush3.bf16.msra.mxu0 %v1142_v3  ;;  %921 = vmatprep.mubr.msk.bf16.mxu0 %vm1066_vm2, %v1065_v2 }
 0x2e5   : > { %919 = vmatprep.subr.bf16.mxu0 %v1065_v2 }
 0x2e8   : > { %920 = vmatpush3.bf16.msra.mxu0 %v1149_v6 }
 0x3a3   : > { %v507_v43 = vpop.f32.mrf.mxu0 }
 0x3a4   : > { %v513_v44 = vadd.f32 %v507_v43, %v353_v42 }
 0x3a5   : > { %v907_v45 = vpop.f32.mrf.mxu0 }
 0x3a6   : > { %v855_v46 = vmul.f32 -1.442695, %v513_v44 }
 0x3a7   : > { %v510_v47 = vpop.f32.mrf.mxu0 }
 0x3a8   : > { %986 = vpow2.f32 %v855_v46 }
 0x3a9   : > { %v908_v48 = vpop.f32.mrf.mxu0  ;;  %988 = vtanh.f32 %v513_v44 }
 0x3b5   : > { %v987_v49 = vpop.eup %986 }
 0x3b6   : > { %v517_v50 = vadd.f32 1.0, %v987_v49  ;;  %v989_v51 = vpop.eup %988 }
 0x3b8   : > { %990 = vrcp.f32 %v517_v50 }
 0x3c5   : > { %v991_v52 = vpop.eup %990 }
 0x3c6   : > { %v521_v53 = vsel %vm370_vm4, %v991_v52, %v989_v51 }
 0x3c7   : > { %524 = vrot.lane.b32.xlu1 %v521_v53, %s1067_s15  ;;  %v522_v56 = vmul.f32 %v521_v53, %v458_v35 }
 0x439   : > { %v525_v54 = vpop.permute.xlu1 %524 }
 0x43a   : > { %v527_v55 = vmul.f32 %v525_v54, %v521_v53 }
 0x43c   : > { %529 = vrot.lane.b32.xlu0 %v527_v55, %s1067_s15 }
 0x4ae   : > { %v530_v57 = vpop.permute.xlu0 %529 }
 0x4af   : > { %v532_v58 = vadd.f32 %v530_v57, %v522_v56 }
 0x4b1   : > { %992 = vtanh.f32 %v532_v58 }
 0x4be   : > { %v993_v59 = vpop.eup %992 }
 0x4bf   : > { %535 = vrot.lane.b32.xlu1 %v993_v59, %s1067_s15 }
 0x531   : > { %v536_v60 = vpop.permute.xlu1 %535 }
 0x532   : > { %v538_v61 = vmul.f32 %v536_v60, %v521_v53 }
 0x534   : > { %v540_v62 = vpack.c.bf16 %v538_v61, %v538_v61 }
 0x536   : > { %542 = vrot.lane.b32.xlu0 %v540_v62, %s1068_s16 }
 0x5a8   : > { %v543_v63 = vpop.permute.xlu0 %542 }
 0x5a9   : > { %914 = vmatmul.mubr.msk.bf16.vlgmr.msra.gmra.mxu1 %vm391_vm3, %v543_v63 }
 0x669   : > { %v581_v0 = vpop.f32.mrf.mxu1 }
 0x66a   : > { %v587_v1 = vadd.f32 %v581_v0, %v1171_v11 }
 0x66b   : > { %v915_v2 = vpop.f32.mrf.mxu1 }
 0x66c   : > { %v857_v3 = vmul.f32 -1.442695, %v587_v1 }
 0x66d   : > { %v584_v4 = vpop.f32.mrf.mxu1 }
 0x66e   : > { %994 = vpow2.f32 %v857_v3 }
 0x66f   : > { %v916_v5 = vpop.f32.mrf.mxu1  ;;  %996 = vtanh.f32 %v587_v1 }
 0x67b   : > { %v995_v6 = vpop.eup %994 }
 0x67c   : > { %v591_v7 = vadd.f32 1.0, %v995_v6  ;;  %v997_v8 = vpop.eup %996 }
 0x67e   : > { %998 = vrcp.f32 %v591_v7 }
 0x68b   : > { %v999_v9 = vpop.eup %998 }
 0x68c   : > { %v595_v10 = vsel %vm370_vm4, %v999_v9, %v997_v8 }
 0x68d   : > { %598 = vrot.lane.b32.xlu1 %v595_v10, %s1067_s15  ;;  %v596_v11 = vmul.f32 %v595_v10, %v532_v58 }
 0x6ff   : > { %v599_v12 = vpop.permute.xlu1 %598 }
 0x700   : > { %v601_v13 = vmul.f32 %v599_v12, %v595_v10 }
 0x702   : > { %603 = vrot.lane.b32.xlu0 %v601_v13, %s1067_s15 }
 0x774   : > { %v604_v14 = vpop.permute.xlu0 %603 }
 0x775   : > { %v606_v15 = vadd.f32 %v604_v14, %v596_v11 }
 0x777   : > { %1000 = vtanh.f32 %v606_v15 }
 0x784   : > { %v1001_v16 = vpop.eup %1000 }
 0x785   : > { %609 = vrot.lane.b32.xlu1 %v1001_v16, %s1067_s15 }
 0x7f7   : > { %v610_v18 = vpop.permute.xlu1 %609 }
 0x7f8   : > { %v612_v19 = vmul.f32 %v610_v18, %v595_v10 }
 0x7fa   : > { %v614_v20 = vpack.c.bf16 %v612_v19, %v612_v19 }
 0x7fc   : > { %616 = vrot.lane.b32.xlu0 %v614_v20, %s1068_s16 }
 0x86e   : > { %v617_v21 = vpop.permute.xlu0 %616 }
 0x86f   : > { %922 = vmatmul.mubr.msk.bf16.vlgmr.msra.gmra.mxu0 %vm391_vm3, %v617_v21 }
 0x92f   : > { %v655_v22 = vpop.f32.mrf.mxu0 }
 0x930   : > { %v661_v23 = vadd.f32 %v655_v22, %v1173_v17 }
 0x931   : > { %v923_v24 = vpop.f32.mrf.mxu0 }
 0x932   : > { %v859_v26 = vmul.f32 -1.442695, %v661_v23 }
 0x933   : > { %v658_v27 = vpop.f32.mrf.mxu0 }
 0x934   : > { %1002 = vpow2.f32 %v859_v26 }
 0x935   : > { %v924_v28 = vpop.f32.mrf.mxu0  ;;  %1004 = vtanh.f32 %v661_v23 }
 0x941   : > { %v1003_v29 = vpop.eup %1002 }
 0x942   : > { %v665_v30 = vadd.f32 1.0, %v1003_v29  ;;  %v1005_v31 = vpop.eup %1004 }
 0x944   : > { %1006 = vrcp.f32 %v665_v30 }
 0x951   : > { %v1007_v32 = vpop.eup %1006 }
 0x952   : > { %v669_v33 = vsel %vm370_vm4, %v1007_v32, %v1005_v31 }
 0x953   : > { %672 = vrot.lane.b32.xlu1 %v669_v33, %s1067_s15  ;;  %v670_v17 = vmul.f32 %v669_v33, %v606_v15 }
 0x9c5   : > { %v673_v34 = vpop.permute.xlu1 %672 }
 0x9c6   : > { %v675_v35 = vmul.f32 %v673_v34, %v669_v33 }
 0x9c8   : > { %677 = vrot.lane.b32.xlu0 %v675_v35, %s1067_s15 }
 0xa3a   : > { %v678_v36 = vpop.permute.xlu0 %677 }
 0xa3b   : > { %v680_v37 = vadd.f32 %v678_v36, %v670_v17 }
 0xa3d   : > { %1008 = vtanh.f32 %v680_v37 }
 0xa4a   : > { %v1009_v38 = vpop.eup %1008 }
 0xa4b   : > { %683 = vrot.lane.b32.xlu1 %v1009_v38, %s1067_s15 }
 0xa4f   : > { %693 = vrot.lane.b32.xlu1 %v680_v37, %s1069_s17 }
 0xabd   : > { %v684_v39 = vpop.permute.xlu1 %683 }
 0xabe   : > { %v686_v40 = vmul.f32 %v684_v39, %v669_v33 }
 0xac0   : > { %688 = vrot.lane.b32.xlu0 %v686_v40, %s1068_s16 }
 0xac1   : > { %v694_v25 = vpop.permute.xlu1 %693 }
 0xac2   : > { %696 = vst.msk [vmem:[#allocation3] sm:$0xff] %vm391_vm3, %v694_v25 }
 0xb2f   : > { %700 = sbr.rel (%p860_p6) target bundleno = 3184 (0xc70), region = 52 }
 0xb32   : > { %v689_v41 = vpop.permute.xlu0 %688 }
 0xb33   : > { %691 = vst.msk [vmem:[#allocation2] sm:$0xff] %vm391_vm3, %v689_v41 }
 0xb34   : > { %v701_v42 = vpack.c.bf16 %v686_v40, %v686_v40  ;;  %v1070_v43 = vmov 0.0   ;;  %v1010_v44 = vld [vmem:[%s1256_s4 + $0x8] sm:$0xff]   ;;  %vm1072_vm5 = vmmov 0   ;;  %v1011_v45 = vld [vmem:[%s1256_s4] sm:$0xff]  }
 0xb35   : > { %925 = vmatprep.subr.bf16.mxu0 %v1070_v43  ;;  %929 = vmatprep.mubr.msk.bf16.mxu0 %vm1072_vm5, %v1070_v43  ;;  %v861_v47 = vld [vmem:[%s1257_s5] ss:$0 sm:$0xff] }
 0xb36   : > { %714 = vrot.lane.b32.xlu0 %v701_v42, %s1071_s20  ;;  %926 = vmatpush3.bf16.msra.mxu0 %v1010_v44 }
 0xb37   : > { %927 = vmatprep.subr.bf16.mxu0 %v1070_v43 }
 0xb3a   : > { %928 = vmatpush3.bf16.msra.mxu0 %v1011_v45 }
 0xba8   : > { %v715_v46 = vpop.permute.xlu0 %714 }
 0xba9   : > { %930 = vmatmul.mubr.msk.bf16.vlgmr.msra.gmra.mxu0 %vm391_vm3, %v715_v46 }
 0xc69   : > { %v765_v48 = vpop.f32.mrf.mxu0 }
 0xc6a   : > { %v766_v49 = vadd.f32 %v861_v47, %v765_v48 }
 0xc6b   : > { %v931_v50 = vpop.f32.mrf.mxu0 }
 0xc6c   : > { %771 = vst [vmem:[#allocation5] sm:$0xff] %v766_v49 }
 0xc6d   : > { %v768_v51 = vpop.f32.mrf.mxu0 }
 0xc6f   : > { %v932_v52 = vpop.f32.mrf.mxu0 }
 0xc70 PF: > { %p1228_p7 = scmp.eq.s32.totalorder %s837_s24, 1  ;;  %s1073_s30 = smov [#allocation5]  }
 0xc71   : > { %s781_s7 = sshll.u32 %s1073_s30, 4  ;;  %s782_s7 = int_to_ptr.vmem [resolvable:$true] %s781_s7 }
 0xc72   : > { %s1012_s8 = scalar_lea.vmem %s782_s7, 128  ;;  %p1019_p11 = scmp.lt.s32.totalorder %s782_s7, %s782_s7 }
 0xc73   : > { %p1013_p8 = scmp.ne.s32.totalorder %s782_s7, %s1012_s8  ;;  %p1020_p12 = scmp.lt.s32.totalorder %s1012_s8, %s1012_s8 }
 0xc75   : > { %p1014_p9 = pnand %p1013_p8, %p1228_p7  ;;  %p1021_p13 = por %p1020_p12, %p1019_p11 }
 0xc77   : > { %p1015_p10 = pneg %p1014_p9 }
 0xc79   : > { %p1022_p0 = pnand %p1021_p13, %p1015_p10 }
 0xc7b   : > { %1025 = shalt.err (!%p1022_p0)
}
 0xc7c   : > { %934 = dma.vmem_to_hbm [thread:$0]  (%p1228_p7), %s782_s7, 128, %s1258_s6, [#allocation6]  }
 0xc7d   : > { %1049 = dma.done.wait (%p1228_p7), [#allocation6], 128  }
 0xc7e   : > { %1051 = vsyncadd (%p1228_p7), [#allocation6], 4294967168 }
 0xc7f PF: > { %s17_s23 = sadd.s32 1, %s1062_s23   ;;  %s1260_s21 = smov %s1058_s22 }
 0xc80   : > { %p14_p1 = scmp.ge.s32.totalorder %s17_s23, 4   ;;  %s1261_s22 = smov %s1263_s25 }
 0xc82   :  { %16 = sbr.rel (!%p14_p1) target bundleno = 2 (0x2), region = 80 }
 0xc87   :  { %794 = vsyncpa [#allocation6], 1 }
 0xc88   :  { %796 = vsyncpa [#allocation6 + $0x1], 1 }

</bundles_post_ra>
